<compile_context>
chip_gen: v6e
topology: v6e:2x2x1
jax: 0.10.0
libtpu: 0.0.40
codegen_flags: <defaults>
</compile_context>

<pallas_src>
import jax
import jax.numpy as jnp
from jax.experimental import pallas as pl
from jax.experimental.pallas import tpu as pltpu


def _round_up(x, m):
    return (x + m - 1) // m * m


def moleculewise_kernel(idx_ref, rep_ref, w1_ref, b1_ref, w2_ref, b2_ref,
                        y_ref, agg_ref):
    # idx_ref: (1, TN) int32      -- molecule index per atom (-1 = padding)
    # rep_ref: (TN, n_in_p)       -- per-atom scalar representation tile
    # w1_ref:  (n_in_p, n_hid_p), b1_ref: (1, n_hid_p)
    # w2_ref:  (n_hid_p, n_out_p), b2_ref: (1, n_out_p)
    # y_ref:   (TM, n_out_p)      -- output block for this molecule slice
    # agg_ref: (TM, n_in_p) f32   -- per-molecule accumulator (scratch)
    a = pl.program_id(1)

    @pl.when(a == 0)
    def _():
        agg_ref[...] = jnp.zeros_like(agg_ref)

    TM = agg_ref.shape[0]
    TN = rep_ref.shape[0]
    m0 = pl.program_id(0) * TM                                   # global mol offset

    idx = idx_ref[...]                                           # (1, TN)
    seg = jax.lax.broadcasted_iota(jnp.int32, (TM, TN), 0) + m0  # (TM, TN)
    onehot = (seg == idx).astype(rep_ref.dtype)                  # exact 0/1

    # scatter_add over molecules for this atom tile == onehot @ representation
    agg_ref[...] += jnp.dot(onehot, rep_ref[...],
                            preferred_element_type=jnp.float32)  # (TM, n_in_p)

    @pl.when(a == pl.num_programs(1) - 1)
    def _():
        agg = agg_ref[...]                                       # f32
        # MLP layer 1: Linear + SiLU (f32 math on VPU/EUP)
        h = jnp.dot(agg, w1_ref[...],
                    preferred_element_type=jnp.float32) + b1_ref[...]
        h = h * jax.lax.logistic(h)                              # SiLU
        # MLP layer 2: Linear (lane-dense padded output -> unmasked store)
        y = jnp.dot(h, w2_ref[...],
                    preferred_element_type=jnp.float32) + b2_ref[...]
        y_ref[...] = y.astype(y_ref.dtype)


def molecule_wise(representation, idx_m, w1, b1, w2, b2, n_molecules):
    """Pallas wrapper: fused scatter_add + 2-layer MLP (aggregation_mode='sum')."""
    N, n_in = representation.shape
    n_hidden = w1.shape[1]
    n_out = w2.shape[1]
    dtype = representation.dtype

    # Lane-dense padding of all feature dims; sublane-aligned molecule dim.
    n_in_p = _round_up(n_in, 128)
    n_hid_p = _round_up(n_hidden, 128)
    n_out_p = _round_up(n_out, 128)

    TM = min(_round_up(n_molecules, 8), 128)       # molecule block (parallel axis)
    maxm_p = _round_up(n_molecules, TM)

    # Atom-axis tile: single aligned tile when small, 512-row tiles otherwise
    # (keeps 2x double-buffered rep tiles well inside v5e/v7x scoped VMEM).
    if N <= 512:
        TN = _round_up(N, 8)
    else:
        TN = 512                                   # multiple of 128
    N_p = _round_up(N, TN)

    # Zero-padded operands (exact: padded atoms get idx=-1 and are dropped,
    # padded features/hidden/out columns contribute exactly zero).
    rep_p = jnp.zeros((N_p, n_in_p), dtype).at[:N, :n_in].set(representation)
    idx_p = jnp.full((1, N_p), -1, jnp.int32).at[0, :N].set(idx_m.astype(jnp.int32))
    w1_p = jnp.zeros((n_in_p, n_hid_p), w1.dtype).at[:n_in, :n_hidden].set(w1)
    b1_p = jnp.zeros((1, n_hid_p), b1.dtype).at[0, :n_hidden].set(b1)
    w2_p = jnp.zeros((n_hid_p, n_out_p), w2.dtype).at[:n_hidden, :n_out].set(w2)
    b2_p = jnp.zeros((1, n_out_p), b2.dtype).at[0, :n_out].set(b2)

    grid = (maxm_p // TM, N_p // TN)

    itemsize = jnp.dtype(dtype).itemsize
    cost = pl.CostEstimate(
        flops=2 * maxm_p * N_p * n_in_p
              + 2 * maxm_p * (n_in_p * n_hid_p + n_hid_p * n_out_p),
        transcendentals=maxm_p * n_hid_p,
        bytes_accessed=(rep_p.size + w1_p.size + w2_p.size) * itemsize
                       + maxm_p * n_out_p * itemsize,
    )

    y_p = pl.pallas_call(
        moleculewise_kernel,
        out_shape=jax.ShapeDtypeStruct((maxm_p, n_out_p), dtype),
        grid=grid,
        in_specs=[
            pl.BlockSpec((1, TN), lambda m, a: (0, a)),            # idx_m
            pl.BlockSpec((TN, n_in_p), lambda m, a: (a, 0)),       # representation
            pl.BlockSpec((n_in_p, n_hid_p), lambda m, a: (0, 0)),  # w1
            pl.BlockSpec((1, n_hid_p), lambda m, a: (0, 0)),       # b1
            pl.BlockSpec((n_hid_p, n_out_p), lambda m, a: (0, 0)), # w2
            pl.BlockSpec((1, n_out_p), lambda m, a: (0, 0)),       # b2
        ],
        out_specs=pl.BlockSpec((TM, n_out_p), lambda m, a: (m, 0)),
        scratch_shapes=[pltpu.VMEM((TM, n_in_p), jnp.float32)],
        compiler_params=pltpu.CompilerParams(
            dimension_semantics=("parallel", "arbitrary"),
            vmem_limit_bytes=32 * 1024 * 1024,
        ),
        cost_estimate=cost,
    )(idx_p, rep_p, w1_p, b1_p, w2_p, b2_p)

    return y_p[:n_molecules, :n_out]


def reference_forward(representation, idx_m, w1, b1, w2, b2, n_molecules):
    """Pure-JAX reference mirroring the PyTorch module (aggregation_mode='sum')."""
    agg = jax.ops.segment_sum(representation, idx_m, num_segments=n_molecules)
    h = agg @ w1 + b1
    h = jax.nn.silu(h)
    return h @ w2 + b2


if __name__ == "__main__":
    # Module config (small, consistent with MoleculeWise defaults)
    n_in = 32          # feature dim of scalar_representation
    n_out = 1
    n_atoms_per_mol = 4
    n_molecules = 2
    N = n_atoms_per_mol * n_molecules   # total atoms in the batch

    # spk.nn.build_mlp default hidden sizing (n_hidden=None, n_layers=2):
    n_hidden = max(n_out, n_in // 2)    # 16

    key = jax.random.PRNGKey(0)
    k_rep, k_w1, k_b1, k_w2, k_b2 = jax.random.split(key, 5)

    representation = jax.random.normal(k_rep, (N, n_in), dtype=jnp.float32)
    idx_m = jnp.repeat(jnp.arange(n_molecules, dtype=jnp.int32), n_atoms_per_mol)

    # Deterministic parameter init (xavier-ish scaling), synthetic weights.
    w1 = jax.random.normal(k_w1, (n_in, n_hidden), dtype=jnp.float32) / jnp.sqrt(n_in)
    b1 = jax.random.normal(k_b1, (n_hidden,), dtype=jnp.float32) * 0.01
    w2 = jax.random.normal(k_w2, (n_hidden, n_out), dtype=jnp.float32) / jnp.sqrt(n_hidden)
    b2 = jax.random.normal(k_b2, (n_out,), dtype=jnp.float32) * 0.01

    y = molecule_wise(representation, idx_m, w1, b1, w2, b2, n_molecules)
    y = jax.block_until_ready(y)

    y_ref = reference_forward(representation, idx_m, w1, b1, w2, b2, n_molecules)
    assert y.shape == (n_molecules, n_out)
    assert jnp.allclose(y, y_ref, atol=1e-4, rtol=1e-4), (y, y_ref)

    print("KERNEL_OK")
</pallas_src>

<mosaic_0001>
module attributes {stable_mosaic.version = 11 : i64} {
  func.func @moleculewise_kernel(%arg0: i32, %arg1: i32, %arg2: memref<1x8xi32, #tpu.memory_space<vmem>>, %arg3: memref<8x128xf32, #tpu.memory_space<vmem>>, %arg4: memref<128x128xf32, #tpu.memory_space<vmem>>, %arg5: memref<1x128xf32, #tpu.memory_space<vmem>>, %arg6: memref<128x128xf32, #tpu.memory_space<vmem>>, %arg7: memref<1x128xf32, #tpu.memory_space<vmem>>, %arg8: memref<8x128xf32, #tpu.memory_space<vmem>>, %arg9: memref<8x128xf32, #tpu.memory_space<vmem>>) attributes {dimension_semantics = [#tpu.dimension_semantics<parallel>, #tpu.dimension_semantics<arbitrary>], iteration_bounds = array<i64: 1, 1>, scalar_prefetch = 0 : i64, scratch_operands = 1 : i64, tpu.core_type = #tpu.core_type<tc>, window_params = [{transform_indices = @transform_0, window_bounds = array<i64: 1, 8>}, {transform_indices = @transform_1, window_bounds = array<i64: 8, 128>}, {pipeline_mode = #tpu.pipeline_mode<synchronous>, transform_indices = @transform_2, window_bounds = array<i64: 128, 128>}, {pipeline_mode = #tpu.pipeline_mode<synchronous>, transform_indices = @transform_3, window_bounds = array<i64: 1, 128>}, {pipeline_mode = #tpu.pipeline_mode<synchronous>, transform_indices = @transform_4, window_bounds = array<i64: 128, 128>}, {pipeline_mode = #tpu.pipeline_mode<synchronous>, transform_indices = @transform_5, window_bounds = array<i64: 1, 128>}, {transform_indices = @transform_6, window_bounds = array<i64: 8, 128>}]} {
    %c0_i32 = arith.constant 0 : i32
    %0 = arith.cmpi eq, %arg1, %c0_i32 : i32
    %1 = arith.extui %0 : i1 to i32
    %c0_i32_0 = arith.constant 0 : i32
    %2 = arith.cmpi ne, %1, %c0_i32_0 : i32
    scf.if %2 {
      %cst_10 = arith.constant 0.000000e+00 : f32
      %20 = vector.broadcast %cst_10 : f32 to vector<8x128xf32>
      %c0_11 = arith.constant 0 : index
      %c0_12 = arith.constant 0 : index
      %21 = vector.load %arg9[%c0_11, %c0_12] : memref<8x128xf32, #tpu.memory_space<vmem>>, vector<8x128xf32>
      tpu.vector_store %arg9[%c0_11, %c0_12], %20 {strides = array<i32>} : memref<8x128xf32, #tpu.memory_space<vmem>>, vector<8x128xf32>,
    } else {
    }
    %c8_i32 = arith.constant 8 : i32
    %3 = arith.muli %arg0, %c8_i32 : i32
    %c0 = arith.constant 0 : index
    %c0_1 = arith.constant 0 : index
    %4 = vector.load %arg2[%c0, %c0_1] : memref<1x8xi32, #tpu.memory_space<vmem>>, vector<1x8xi32>
    %5 = tpu.iota {dimensions = array<i32: 0>} : vector<8x8xi32>
    %6 = vector.broadcast %3 : i32 to vector<8x8xi32>
    %7 = arith.addi %5, %6 : vector<8x8xi32>
    %8 = vector.broadcast %4 : vector<1x8xi32> to vector<8x8xi32>
    %9 = arith.cmpi eq, %7, %8 : vector<8x8xi32>
    %10 = arith.extui %9 : vector<8x8xi1> to vector<8x8xi32>
    %11 = arith.sitofp %10 : vector<8x8xi32> to vector<8x8xf32>
    %c0_2 = arith.constant 0 : index
    %c0_3 = arith.constant 0 : index
    %12 = vector.load %arg9[%c0_2, %c0_3] : memref<8x128xf32, #tpu.memory_space<vmem>>, vector<8x128xf32>
    %c0_4 = arith.constant 0 : index
    %c0_5 = arith.constant 0 : index
    %13 = vector.load %arg3[%c0_4, %c0_5] : memref<8x128xf32, #tpu.memory_space<vmem>>, vector<8x128xf32>
    %cst = arith.constant dense<0.000000e+00> : vector<8x128xf32>
    %14 = tpu.matmul %11, %13, %cst {dimension_numbers = #tpu.dot_dimension_numbers<[1], [0], [0], [1], [0, 0, 1, 1], [], []>} : vector<8x8xf32>, vector<8x128xf32>, vector<8x128xf32> -> vector<8x128xf32>
    %15 = arith.addf %12, %14 : vector<8x128xf32>
    %c0_6 = arith.constant 0 : index
    %c0_7 = arith.constant 0 : index
    %16 = vector.load %arg9[%c0_6, %c0_7] : memref<8x128xf32, #tpu.memory_space<vmem>>, vector<8x128xf32>
    tpu.vector_store %arg9[%c0_6, %c0_7], %15 {strides = array<i32>} : memref<8x128xf32, #tpu.memory_space<vmem>>, vector<8x128xf32>,
    %c0_i32_8 = arith.constant 0 : i32
    %17 = arith.cmpi eq, %arg1, %c0_i32_8 : i32
    %18 = arith.extui %17 : i1 to i32
    %c0_i32_9 = arith.constant 0 : i32
    %19 = arith.cmpi ne, %18, %c0_i32_9 : i32
    scf.if %19 {
      %c0_10 = arith.constant 0 : index
      %c0_11 = arith.constant 0 : index
      %20 = vector.load %arg9[%c0_10, %c0_11] : memref<8x128xf32, #tpu.memory_space<vmem>>, vector<8x128xf32>
      %c0_12 = arith.constant 0 : index
      %c0_13 = arith.constant 0 : index
      %21 = vector.load %arg4[%c0_12, %c0_13] : memref<128x128xf32, #tpu.memory_space<vmem>>, vector<128x128xf32>
      %cst_14 = arith.constant dense<0.000000e+00> : vector<8x128xf32>
      %22 = tpu.matmul %20, %21, %cst_14 {dimension_numbers = #tpu.dot_dimension_numbers<[1], [0], [0], [1], [0, 0, 1, 1], [], []>} : vector<8x128xf32>, vector<128x128xf32>, vector<8x128xf32> -> vector<8x128xf32>
      %c0_15 = arith.constant 0 : index
      %c0_16 = arith.constant 0 : index
      %23 = vector.load %arg5[%c0_15, %c0_16] : memref<1x128xf32, #tpu.memory_space<vmem>>, vector<1x128xf32>
      %24 = vector.broadcast %23 : vector<1x128xf32> to vector<8x128xf32>
      %25 = arith.addf %22, %24 : vector<8x128xf32>
      %26 = arith.negf %25 : vector<8x128xf32>
      %27 = math.exp %26 : vector<8x128xf32>
      %cst_17 = arith.constant 1.000000e+00 : f32
      %28 = vector.broadcast %cst_17 : f32 to vector<8x128xf32>
      %29 = arith.addf %28, %27 : vector<8x128xf32>
      %30 = arith.divf %28, %29 : vector<8x128xf32>
      %31 = arith.mulf %25, %30 : vector<8x128xf32>
      %c0_18 = arith.constant 0 : index
      %c0_19 = arith.constant 0 : index
      %32 = vector.load %arg6[%c0_18, %c0_19] : memref<128x128xf32, #tpu.memory_space<vmem>>, vector<128x128xf32>
      %cst_20 = arith.constant dense<0.000000e+00> : vector<8x128xf32>
      %33 = tpu.matmul %31, %32, %cst_20 {dimension_numbers = #tpu.dot_dimension_numbers<[1], [0], [0], [1], [0, 0, 1, 1], [], []>} : vector<8x128xf32>, vector<128x128xf32>, vector<8x128xf32> -> vector<8x128xf32>
      %c0_21 = arith.constant 0 : index
      %c0_22 = arith.constant 0 : index
      %34 = vector.load %arg7[%c0_21, %c0_22] : memref<1x128xf32, #tpu.memory_space<vmem>>, vector<1x128xf32>
      %35 = vector.broadcast %34 : vector<1x128xf32> to vector<8x128xf32>
      %36 = arith.addf %33, %35 : vector<8x128xf32>
      %c0_23 = arith.constant 0 : index
      %c0_24 = arith.constant 0 : index
      %37 = vector.load %arg8[%c0_23, %c0_24] : memref<8x128xf32, #tpu.memory_space<vmem>>, vector<8x128xf32>
      tpu.vector_store %arg8[%c0_23, %c0_24], %36 {strides = array<i32>} : memref<8x128xf32, #tpu.memory_space<vmem>>, vector<8x128xf32>,
    } else {
    }
    return
  }
  func.func @transform_0(%arg0: i32, %arg1: i32) -> (i32, i32) {
    %c0_i32 = arith.constant 0 : i32
    %c0_i32_0 = arith.constant 0 : i32
    return %c0_i32, %arg1 : i32, i32
  }
  func.func @transform_1(%arg0: i32, %arg1: i32) -> (i32, i32) {
    %c0_i32 = arith.constant 0 : i32
    %c0_i32_0 = arith.constant 0 : i32
    return %arg1, %c0_i32 : i32, i32
  }
  func.func @transform_2(%arg0: i32, %arg1: i32) -> (i32, i32) {
    %c0_i32 = arith.constant 0 : i32
    %c0_i32_0 = arith.constant 0 : i32
    %c0_i32_1 = arith.constant 0 : i32
    return %c0_i32, %c0_i32_0 : i32, i32
  }
  func.func @transform_3(%arg0: i32, %arg1: i32) -> (i32, i32) {
    %c0_i32 = arith.constant 0 : i32
    %c0_i32_0 = arith.constant 0 : i32
    %c0_i32_1 = arith.constant 0 : i32
    return %c0_i32, %c0_i32_0 : i32, i32
  }
  func.func @transform_4(%arg0: i32, %arg1: i32) -> (i32, i32) {
    %c0_i32 = arith.constant 0 : i32
    %c0_i32_0 = arith.constant 0 : i32
    %c0_i32_1 = arith.constant 0 : i32
    return %c0_i32, %c0_i32_0 : i32, i32
  }
  func.func @transform_5(%arg0: i32, %arg1: i32) -> (i32, i32) {
    %c0_i32 = arith.constant 0 : i32
    %c0_i32_0 = arith.constant 0 : i32
    %c0_i32_1 = arith.constant 0 : i32
    return %c0_i32, %c0_i32_0 : i32, i32
  }
  func.func @transform_6(%arg0: i32, %arg1: i32) -> (i32, i32) {
    %c0_i32 = arith.constant 0 : i32
    %c0_i32_0 = arith.constant 0 : i32
    return %arg0, %c0_i32 : i32, i32
  }
}

</mosaic_0001>

<bundles_post_ra>
// kernel: tpu_custom_call.1
= control target key start
LH: loop header
LB: loop body
LE: loop exit
PB: predicated region body
PF: predicated region fallthrough
CT: control target
= control target key end

     0   :  { %11 = vsyncpa [#allocation4], 0  ;;  %s729_s0 = inlined_call_operand.hbm [shape: s32[1,8], index: 0, kind: input, shape index: {}]   ;;  %s730_s1 = inlined_call_operand.hbm [shape: f32[8,128], index: 1, kind: input, shape index: {}]   ;;  %s731_s2 = inlined_call_operand.hbm [shape: f32[128,128], index: 2, kind: input, shape index: {}]   ;;  %s732_s3 = inlined_call_operand.vmem [shape: f32[1,128], index: 3, kind: input, shape index: {}]   ;;  %s733_s4 = inlined_call_operand.hbm [shape: f32[128,128], index: 4, kind: input, shape index: {}]   ;;  %s734_s5 = inlined_call_operand.vmem [shape: f32[1,128], index: 5, kind: input, shape index: {}]   ;;  %s735_s6 = inlined_call_operand.hbm [shape: f32[8,128], index: 6, kind: output, shape index: {}]  }
   0x1   :  { %12 = vsyncpa [#allocation7], 0 }
   0x2   :  { %13 = vsyncpa [#allocation10], 0 }
   0x3   :  { %14 = vsyncpa [#allocation5], 0  ;;  %s624_s21 = smov [#allocation6]   ;;  %s625_s23 = smov [#allocation3]  }
   0x4   :  { %s31_s22 = sshll.u32 %s624_s21, 4  ;;  %s21_s24 = sshll.u32 %s625_s23, 4  ;;  %s32_s22 = int_to_ptr.vmem [resolvable:$true] %s31_s22  ;;  %s22_s24 = int_to_ptr.vmem [resolvable:$true] %s21_s24 }
   0x5   :  { %s524_s25 = scalar_lea.vmem %s32_s22, 128  ;;  %p529_p1 = scmp.lt.s32.totalorder %s32_s22, %s32_s22 }
   0x6   :  { %p525_p0 = scmp.ne.s32.totalorder %s32_s22, %s524_s25  ;;  %p530_p2 = scmp.lt.s32.totalorder %s524_s25, %s524_s25 }
   0x8   :  { %p531_p3 = por %p530_p2, %p529_p1 }
   0xa   :  { %p532_p4 = pnand %p531_p3, %p525_p0 }
   0xc   :  { %535 = shalt.err (!%p532_p4)
}
   0xd   :  { %34 = dma.hbm_to_vmem [thread:$0]  %s730_s1, 128, %s32_s22, [#allocation7]  }
   0xe   :  { %s544_s28 = scalar_lea.vmem %s22_s24, 16  ;;  %s548_s29 = scalar_lea.vmem %s22_s24, 32 }
   0xf   :  { %p545_p5 = scmp.ne.s32.totalorder %s22_s24, %s544_s28  ;;  %p549_p6 = scmp.lt.s32.totalorder %s22_s24, %s22_s24 }
  0x10   :  { %p550_p7 = scmp.lt.s32.totalorder %s548_s29, %s544_s28 }
  0x12   :  { %p551_p8 = por %p550_p7, %p549_p6 }
  0x14   :  { %p552_p9 = pnand %p551_p8, %p545_p5 }
  0x16   :  { %555 = shalt.err (!%p552_p9)
}
  0x17   :  { %24 = dma.hbm_to_vmem [thread:$0]  %s729_s0, 16, %s22_s24, [#allocation4]  }
  0x18   :  { %s626_s8 = smov [#allocation8]  }
  0x19   :  { %s40_s9 = sshll.u32 %s626_s8, 4  ;;  %s41_s9 = int_to_ptr.vmem [resolvable:$true] %s40_s9 }
  0x1a   :  { %s564_s10 = scalar_lea.vmem %s41_s9, 2048  ;;  %p569_p11 = scmp.lt.s32.totalorder %s41_s9, %s41_s9 }
  0x1b   :  { %p565_p10 = scmp.ne.s32.totalorder %s41_s9, %s564_s10  ;;  %p570_p12 = scmp.lt.s32.totalorder %s564_s10, %s564_s10 }
  0x1d   :  { %p571_p13 = por %p570_p12, %p569_p11 }
  0x1f   :  { %p572_p0 = pnand %p571_p13, %p565_p10 }
  0x21   :  { %575 = shalt.err (!%p572_p0)
}
  0x22   :  { %s627_s1 = smov 128   ;;  %s628_s11 = smov 8  }
  0x23   :  { %46 = dma.hbm_to_vmem [thread:$0]  %s731_s2, 2048, %s41_s9, [#allocation7], %s627_s1, %s627_s1, %s628_s11  }
  0x24   :  { %s629_s14 = smov [#allocation9]  }
  0x25   :  { %s54_s15 = sshll.u32 %s629_s14, 4  ;;  %s55_s15 = int_to_ptr.vmem [resolvable:$true] %s54_s15 }
  0x26   :  { %s584_s0 = scalar_lea.vmem %s55_s15, 2048  ;;  %p589_p2 = scmp.lt.s32.totalorder %s55_s15, %s55_s15 }
  0x27   :  { %p585_p1 = scmp.ne.s32.totalorder %s55_s15, %s584_s0  ;;  %p590_p3 = scmp.lt.s32.totalorder %s584_s0, %s584_s0 }
  0x29   :  { %p591_p4 = por %p590_p3, %p589_p2 }
  0x2b   :  { %p592_p5 = pnand %p591_p4, %p585_p1 }
  0x2d   :  { %595 = shalt.err (!%p592_p5)
}
  0x2e   :  { %60 = dma.hbm_to_vmem [thread:$0]  %s733_s4, 2048, %s55_s15, [#allocation10], %s627_s1, %s627_s1, %s628_s11  }
  0x2f   :  { %616 = dma.done.wait [#allocation4], 16  }
  0x30   :  { %617 = vsyncadd [#allocation4], 4294967280 }
  0x31   :  { %618 = dma.done.wait [#allocation7], 2176  }
  0x32   :  { %619 = vsyncadd [#allocation7], 4294965120 }
  0x33   :  { %620 = dma.done.wait [#allocation10], 2048  }
  0x34   :  { %621 = vsyncadd [#allocation10], 4294965248  ;;  %v82_v0 = vlaneseq  ;;  %v630_v1 = vmov 0.0   ;;  %vm631_vm0 = vmmov 0   ;;  %v94_v3 = vld [vmem:[#allocation6] sm:$0xff]  ;;  %vm95_vm1 = vcmask 64512  }
  0x35   :  { %428 = vmatprep.subr.mxu0 %v630_v1  ;;  %430 = vmatprep.mubr.msk.f32.mxu0 %vm631_vm0, %v630_v1  ;;  %v386_v4 = vld [vmem:[#allocation3] ss:$0 sm:$0xff]  ;;  %v190_v5 = vld [vmem:[#allocation8 + $0x78] sm:$0xff]  ;;  %v188_v8 = vld [vmem:[#allocation8 + $0x68] sm:$0xff]  ;;  %s632_s20 = smov [#allocation11]  }
  0x36   :  { %433 = vmatprep.subr.mxu1 %v630_v1  ;;  %465 = vmatprep.mubr.msk.f32.mxu1 %vm631_vm0, %v630_v1  ;;  %v83_v2 = vshrl.u32 %v82_v0, 7  ;;  %v189_v6 = vld [vmem:[#allocation8 + $0x70] sm:$0xff]  ;;  %v187_v9 = vld [vmem:[#allocation8 + $0x60] sm:$0xff]  ;;  %v186_v10 = vld [vmem:[#allocation8 + $0x58] sm:$0xff]  ;;  %s375_s21 = sshll.u32 %s632_s20, 4  ;;  %s376_s21 = int_to_ptr.vmem [resolvable:$true] %s375_s21 }
  0x37   :  { %429 = vmatpush3.msra.mxu0 %v94_v3  ;;  %434 = vmatpush3.msra.mxu1 %v190_v5  ;;  %v185_v11 = vld [vmem:[#allocation8 + $0x50] sm:$0xff]  ;;  %v184_v12 = vld [vmem:[#allocation8 + $0x48] sm:$0xff]  ;;  %v183_v13 = vld [vmem:[#allocation8 + $0x40] sm:$0xff]  ;;  %p601_p7 = scmp.lt.s32.totalorder %s376_s21, %s376_s21 }
  0x38   :  { %vm90_vm2 = vcmp.eq.s32.totalorder %v83_v2, %v386_v4  ;;  %435 = vmatprep.subr.mxu1 %v630_v1  ;;  %468 = vmatprep.subr.mxu0 %v630_v1  ;;  %v182_v14 = vld [vmem:[#allocation8 + $0x38] sm:$0xff]  ;;  %v181_v15 = vld [vmem:[#allocation8 + $0x30] sm:$0xff]  ;;  %v180_v16 = vld [vmem:[#allocation8 + $0x28] sm:$0xff] }
  0x39   :  { %v387_v7 = vsel %vm90_vm2, 1.0, %v630_v1  ;;  %436 = vmatpush3.msra.mxu1 %v189_v6  ;;  %v179_v17 = vld [vmem:[#allocation8 + $0x20] sm:$0xff]  ;;  %v178_v18 = vld [vmem:[#allocation8 + $0x18] sm:$0xff]  ;;  %v177_v19 = vld [vmem:[#allocation8 + $0x10] sm:$0xff] }
  0x3a   :  { %431 = vmatmul.mubr.msk.f32.vlgmr.msra.gmra.mxu0 %vm95_vm1, %v387_v7  ;;  %437 = vmatprep.subr.mxu1 %v630_v1  ;;  %v176_v20 = vld [vmem:[#allocation8 + $0x8] sm:$0xff]  ;;  %v175_v21 = vld [vmem:[#allocation8] sm:$0xff]  ;;  %v290_v24 = vld [vmem:[#allocation9 + $0x78] sm:$0xff] }
  0x3b   :  { %500 = vmatprep.mubr.msk.f32.mxu0 %vm631_vm0, %v630_v1  ;;  %438 = vmatpush3.msra.mxu1 %v188_v8  ;;  %v289_v25 = vld [vmem:[#allocation9 + $0x70] sm:$0xff]  ;;  %v288_v26 = vld [vmem:[#allocation9 + $0x68] sm:$0xff]  ;;  %v287_v27 = vld [vmem:[#allocation9 + $0x60] sm:$0xff] }
  0x3c   :  { %439 = vmatprep.subr.mxu1 %v630_v1  ;;  %469 = vmatpush3.msra.mxu0 %v290_v24  ;;  %v286_v28 = vld [vmem:[#allocation9 + $0x58] sm:$0xff]  ;;  %v285_v29 = vld [vmem:[#allocation9 + $0x50] sm:$0xff]  ;;  %v284_v30 = vld [vmem:[#allocation9 + $0x48] sm:$0xff] }
  0x3d   :  { %440 = vmatpush3.msra.mxu1 %v187_v9  ;;  %470 = vmatprep.subr.mxu0 %v630_v1  ;;  %v283_v31 = vld [vmem:[#allocation9 + $0x40] sm:$0xff]  ;;  %v282_v32 = vld [vmem:[#allocation9 + $0x38] sm:$0xff]  ;;  %v281_v33 = vld [vmem:[#allocation9 + $0x30] sm:$0xff] }
  0x3e   :  { %441 = vmatprep.subr.mxu1 %v630_v1  ;;  %471 = vmatpush3.msra.mxu0 %v289_v25  ;;  %v280_v34 = vld [vmem:[#allocation9 + $0x28] sm:$0xff]  ;;  %v279_v35 = vld [vmem:[#allocation9 + $0x20] sm:$0xff]  ;;  %v278_v36 = vld [vmem:[#allocation9 + $0x18] sm:$0xff] }
  0x3f   :  { %442 = vmatpush3.msra.mxu1 %v186_v10  ;;  %472 = vmatprep.subr.mxu0 %v630_v1  ;;  %v277_v37 = vld [vmem:[#allocation9 + $0x10] sm:$0xff]  ;;  %v276_v38 = vld [vmem:[#allocation9 + $0x8] sm:$0xff]  ;;  %v275_v39 = vld [vmem:[#allocation9] sm:$0xff] }
  0x40   :  { %443 = vmatprep.subr.mxu1 %v630_v1  ;;  %473 = vmatpush3.msra.mxu0 %v288_v26  ;;  %v389_v40 = vld [vmem:[%s732_s3] ss:$0 sm:$0xff]  ;;  %s596_s3 = scalar_lea.vmem %s376_s21, 128 }
  0x41   :  { %444 = vmatpush3.msra.mxu1 %v185_v11  ;;  %474 = vmatprep.subr.mxu0 %v630_v1  ;;  %v391_v49 = vld [vmem:[%s734_s5] ss:$0 sm:$0xff]  ;;  %p597_p6 = scmp.ne.s32.totalorder %s376_s21, %s596_s3  ;;  %p602_p8 = scmp.lt.s32.totalorder %s596_s3, %s596_s3 }
  0x42   :  { %445 = vmatprep.subr.mxu1 %v630_v1  ;;  %475 = vmatpush3.msra.mxu0 %v287_v27 }
  0x43   :  { %446 = vmatpush3.msra.mxu1 %v184_v12  ;;  %476 = vmatprep.subr.mxu0 %v630_v1  ;;  %p603_p9 = por %p602_p8, %p601_p7 }
  0x44   :  { %447 = vmatprep.subr.mxu1 %v630_v1  ;;  %477 = vmatpush3.msra.mxu0 %v286_v28 }
  0x45   :  { %448 = vmatpush3.msra.mxu1 %v183_v13  ;;  %478 = vmatprep.subr.mxu0 %v630_v1  ;;  %p604_p10 = pnand %p603_p9, %p597_p6 }
  0x46   :  { %449 = vmatprep.subr.mxu1 %v630_v1  ;;  %479 = vmatpush3.msra.mxu0 %v285_v29 }
  0x47   :  { %450 = vmatpush3.msra.mxu1 %v182_v14  ;;  %480 = vmatprep.subr.mxu0 %v630_v1 }
  0x48   :  { %451 = vmatprep.subr.mxu1 %v630_v1  ;;  %481 = vmatpush3.msra.mxu0 %v284_v30 }
  0x49   :  { %452 = vmatpush3.msra.mxu1 %v181_v15  ;;  %482 = vmatprep.subr.mxu0 %v630_v1 }
  0x4a   :  { %453 = vmatprep.subr.mxu1 %v630_v1  ;;  %483 = vmatpush3.msra.mxu0 %v283_v31 }
  0x4b   :  { %454 = vmatpush3.msra.mxu1 %v180_v16  ;;  %484 = vmatprep.subr.mxu0 %v630_v1 }
  0x4c   :  { %455 = vmatprep.subr.mxu1 %v630_v1  ;;  %485 = vmatpush3.msra.mxu0 %v282_v32 }
  0x4d   :  { %456 = vmatpush3.msra.mxu1 %v179_v17  ;;  %486 = vmatprep.subr.mxu0 %v630_v1 }
  0x4e   :  { %457 = vmatprep.subr.mxu1 %v630_v1  ;;  %487 = vmatpush3.msra.mxu0 %v281_v33 }
  0x4f   :  { %458 = vmatpush3.msra.mxu1 %v178_v18  ;;  %488 = vmatprep.subr.mxu0 %v630_v1 }
  0x50   :  { %459 = vmatprep.subr.mxu1 %v630_v1  ;;  %489 = vmatpush3.msra.mxu0 %v280_v34 }
  0x51   :  { %460 = vmatpush3.msra.mxu1 %v177_v19  ;;  %490 = vmatprep.subr.mxu0 %v630_v1 }
  0x52   :  { %461 = vmatprep.subr.mxu1 %v630_v1  ;;  %491 = vmatpush3.msra.mxu0 %v279_v35 }
  0x53   :  { %462 = vmatpush3.msra.mxu1 %v176_v20  ;;  %492 = vmatprep.subr.mxu0 %v630_v1 }
  0x54   :  { %463 = vmatprep.subr.mxu1 %v630_v1  ;;  %493 = vmatpush3.msra.mxu0 %v278_v36 }
  0x55   :  { %464 = vmatpush3.msra.mxu1 %v175_v21  ;;  %494 = vmatprep.subr.mxu0 %v630_v1 }
  0x56   :  { %495 = vmatpush3.msra.mxu0 %v277_v37 }
  0x57   :  { %496 = vmatprep.subr.mxu0 %v630_v1 }
  0x58   :  { %497 = vmatpush3.msra.mxu0 %v276_v38 }
  0x59   :  { %498 = vmatprep.subr.mxu0 %v630_v1 }
  0x5a   :  { %499 = vmatpush3.msra.mxu0 %v275_v39 }
  0xfa   :  { %v165_v22 = vpop.f32.mrf.mxu0 }
  0xfb   :  { %466 = vmatmul.mubr.f32.vlgmr.msra.gmra.mxu1 %v165_v22 }
  0xfc   :  { %v432_v23 = vpop.f32.mrf.mxu0 }
 0x1bb   :  { %v264_v41 = vpop.f32.mrf.mxu1 }
 0x1bc   :  { %v265_v42 = vadd.f32 %v389_v40, %v264_v41 }
 0x1bd   :  { %v467_v43 = vpop.f32.mrf.mxu1 }
 0x1be   :  { %v390_v44 = vmul.f32 -1.442695, %v265_v42 }
 0x1c0   :  { %512 = vpow2.f32 %v390_v44 }
 0x1cd   :  { %v513_v45 = vpop.eup %512 }
 0x1ce   :  { %v271_v46 = vadd.f32 1.0, %v513_v45 }
 0x1d0   :  { %514 = vrcp.f32 %v271_v46 }
 0x1dd   :  { %v515_v47 = vpop.eup %514 }
 0x1de   :  { %v274_v48 = vmul.f32 %v515_v47, %v265_v42 }
 0x1e0   :  { %501 = vmatmul.mubr.f32.vlgmr.msra.gmra.mxu0 %v274_v48 }
 0x2a0   :  { %v364_v50 = vpop.f32.mrf.mxu0 }
 0x2a1   :  { %v365_v51 = vadd.f32 %v391_v49, %v364_v50 }
 0x2a2   :  { %v502_v52 = vpop.f32.mrf.mxu0 }
 0x2a3   :  { %368 = vst [vmem:[#allocation11] sm:$0xff] %v365_v51 }
 0x2a4   :  { %607 = shalt.err (!%p604_p10)
}
 0x2a5   :  { %378 = dma.vmem_to_hbm [thread:$0]  %s376_s21, 128, %s735_s6, [#allocation5]  }
 0x2a6   :  { %622 = dma.done.wait [#allocation5], 128  }
 0x2a7   :  { %623 = vsyncadd [#allocation5], 4294967168 }
 0x2a8   :  { %382 = vsyncpa [#allocation4], 1 }
 0x2a9   :  { %383 = vsyncpa [#allocation7], 1 }
 0x2aa   :  { %384 = vsyncpa [#allocation10], 1 }
 0x2ab   :  { %385 = vsyncpa [#allocation5], 1 }

</bundles_post_ra>
